<compile_context>
chip_gen: v6e
topology: v6e:2x2x1
jax: 0.10.0
libtpu: 0.0.40
codegen_flags: <defaults>
</compile_context>

<pallas_src>
import math

import jax
import jax.numpy as jnp
from jax.experimental import pallas as pl
from jax.experimental.pallas import tpu as pltpu


# ----------------------------------------------------------------------------- helpers
def _round_up(x, m):
    return ((x + m - 1) // m) * m


def _pick_tile(dim, max_tile, unit):
    """Pick (tile, padded_dim): tile is a multiple of `unit`, <= max_tile, and
    divides padded_dim.  Prefers tiles that keep padding minimal."""
    max_tile = max((max_tile // unit) * unit, unit)
    dim_u = _round_up(max(dim, 1), unit)
    if dim_u <= max_tile:
        return dim_u, dim_u
    # Prefer a tile (>= max_tile // 2) that divides the minimally padded dim.
    t = max_tile
    while t >= max(unit, max_tile // 2):
        if dim_u % t == 0:
            return t, dim_u
        t -= unit
    # Otherwise accept up to one extra tile of padding.
    return max_tile, _round_up(dim, max_tile)


def _default_config():
    """Generation-aware tile / VMEM defaults."""
    try:
        vmem_phys = pltpu.get_tpu_info().vmem_capacity_bytes
    except Exception:
        vmem_phys = 64 * 1024 * 1024  # conservative (v7x per-TC size)
    if vmem_phys <= 64 * 1024 * 1024:
        # v7x-like: 64 MiB per TensorCore -> smaller tiles, modest scoped limit.
        return dict(vmem_limit=40 * 1024 * 1024, tm=768, tn=768, tk=512)
    # v5e / v6e: 128 MiB physical -> big tiles, raise the scoped limit past 32 MiB.
    return dict(vmem_limit=80 * 1024 * 1024, tm=1024, tn=1024, tk=512)


# ----------------------------------------------------------------------------- kernels
def _linear_bias_kernel(x_ref, w_ref, b_ref, o_ref):
    """Single-K-tile path (weight-resident / grid_k == 1): no scratch needed."""
    acc = jnp.dot(x_ref[...], w_ref[...], preferred_element_type=jnp.float32)
    o_ref[...] = (acc + b_ref[...].astype(jnp.float32)).astype(o_ref.dtype)


def _linear_acc_kernel(x_ref, w_ref, b_ref, o_ref, acc_ref):
    """3-D tiled path with an f32 VMEM accumulator; bias folded into the init."""
    k = pl.program_id(2)

    @pl.when(k == 0)
    def _():
        acc_ref[...] = jnp.broadcast_to(
            b_ref[...].astype(jnp.float32), acc_ref.shape)

    acc_ref[...] += jnp.dot(x_ref[...], w_ref[...],
                            preferred_element_type=jnp.float32)

    @pl.when(k == pl.num_programs(2) - 1)
    def _():
        o_ref[...] = acc_ref[...].astype(o_ref.dtype)


# ----------------------------------------------------------------------------- module
class PallasLinear:
    """y = x @ W^T + b with the weight/bias prepared (transpose/pad/cast) once."""

    def __init__(self, weight, bias, *, compute_dtype=jnp.bfloat16,
                 tm=None, tn=None, tk=None, out_dtype=None,
                 weight_resident_bytes=4 * 1024 * 1024,
                 force_tiled=False, w_buffers=None):
        cfg = _default_config()
        self.vmem_limit = cfg["vmem_limit"]
        self.tm_max = tm if tm is not None else cfg["tm"]
        tn_max = tn if tn is not None else cfg["tn"]
        tk_max = tk if tk is not None else cfg["tk"]

        self.compute_dtype = jnp.dtype(compute_dtype)
        self.out_dtype = out_dtype          # None -> keep x.dtype
        self.w_buffers = w_buffers          # optional pl.Buffered depth for W

        out_dim, in_dim = weight.shape      # PyTorch layout (out_dim, in_dim)
        self.in_dim, self.out_dim = in_dim, out_dim

        in_128 = _round_up(in_dim, 128)
        out_128 = _round_up(out_dim, 128)
        itemsize = self.compute_dtype.itemsize

        # Weight-resident / single-K fast path for small GNN-style weights:
        # keep K (and, when possible, N) un-tiled so the weight is DMA'd once
        # and no f32 accumulator is needed.
        small_weight = (not force_tiled and
                        in_128 * out_128 * itemsize <= weight_resident_bytes)
        if small_weight:
            tk_max = max(tk_max, min(in_128, 2048))
            tn_max = max(tn_max, min(out_128, 2048))

        self.tk, self.in_pad = _pick_tile(in_dim, tk_max, 128)
        self.tn, self.out_pad = _pick_tile(out_dim, tn_max, 128)

        # ---- hoisted, one-time parameter prep (transpose + pad + cast) ----
        w_t = jnp.asarray(weight).T                       # (in_dim, out_dim)
        if (self.in_pad, self.out_pad) != (in_dim, out_dim):
            w_t = jnp.pad(w_t, ((0, self.in_pad - in_dim),
                                (0, self.out_pad - out_dim)))
        self.w_p = w_t.astype(self.compute_dtype)

        b = jnp.asarray(bias)
        if self.out_pad != out_dim:
            b = jnp.pad(b, (0, self.out_pad - out_dim))
        self.b_p = b.astype(jnp.float32).reshape(1, self.out_pad)

    def __call__(self, x):
        orig_shape = x.shape
        assert orig_shape[-1] == self.in_dim, "in_dim mismatch"
        out_dtype = self.out_dtype if self.out_dtype is not None else x.dtype

        x2d = x.reshape(-1, self.in_dim)
        n = x2d.shape[0]

        tm, n_pad = _pick_tile(n, self.tm_max, 8)
        gj = self.out_pad // self.tn
        gk = self.in_pad // self.tk
        gi = n_pad // tm
        # Megacore nudge: give both TensorCores a block when everything fits
        # into a single output tile but M is big enough to split.
        if gi * gj == 1 and tm >= 512 and tm % 16 == 0:
            tm //= 2
            gi = n_pad // tm

        pad_n, pad_k = n_pad - n, self.in_pad - self.in_dim
        if pad_n or pad_k:
            x2d = jnp.pad(x2d, ((0, pad_n), (0, pad_k)))
        if x2d.dtype != self.compute_dtype:
            x2d = x2d.astype(self.compute_dtype)

        itemsize = self.compute_dtype.itemsize
        out_itemsize = jnp.dtype(out_dtype).itemsize
        x_reads = 1 if gk == 1 else gj                      # x re-read per j pass
        w_reads = 1 if (gj == 1 and gk == 1) else gi        # W re-read per i pass
        cost = pl.CostEstimate(
            flops=2 * n_pad * self.in_pad * self.out_pad,
            transcendentals=0,
            bytes_accessed=(n_pad * self.in_pad * itemsize * x_reads
                            + self.in_pad * self.out_pad * itemsize * w_reads
                            + self.out_pad * 4
                            + n_pad * self.out_pad * out_itemsize),
        )

        w_spec_kwargs = {}
        if self.w_buffers is not None:
            w_spec_kwargs["pipeline_mode"] = pl.Buffered(self.w_buffers)

        tn, tk = self.tn, self.tk
        if gk == 1:
            # Scratch-free path: K fits in one tile (weight resident when gj==1).
            grid_spec = pltpu.PrefetchScalarGridSpec(
                num_scalar_prefetch=0,
                grid=(gi, gj),
                in_specs=[
                    pl.BlockSpec((tm, tk), lambda i, j: (i, 0)),                 # x
                    pl.BlockSpec((tk, tn), lambda i, j: (0, j), **w_spec_kwargs),  # W
                    pl.BlockSpec((1, tn), lambda i, j: (0, j)),                  # bias
                ],
                out_specs=pl.BlockSpec((tm, tn), lambda i, j: (i, j)),
            )
            kernel = _linear_bias_kernel
            dims = ("parallel", "parallel")
        else:
            grid_spec = pltpu.PrefetchScalarGridSpec(
                num_scalar_prefetch=0,
                grid=(gi, gj, gk),
                in_specs=[
                    pl.BlockSpec((tm, tk), lambda i, j, k: (i, k)),                 # x
                    pl.BlockSpec((tk, tn), lambda i, j, k: (k, j), **w_spec_kwargs),  # W
                    pl.BlockSpec((1, tn), lambda i, j, k: (0, j)),                  # bias
                ],
                out_specs=pl.BlockSpec((tm, tn), lambda i, j, k: (i, j)),
                scratch_shapes=[pltpu.VMEM((tm, tn), jnp.float32)],
            )
            kernel = _linear_acc_kernel
            dims = ("parallel", "parallel", "arbitrary")

        y_pad = pl.pallas_call(
            kernel,
            out_shape=jax.ShapeDtypeStruct((n_pad, self.out_pad), out_dtype),
            grid_spec=grid_spec,
            compiler_params=pltpu.CompilerParams(
                dimension_semantics=dims,
                vmem_limit_bytes=self.vmem_limit,
            ),
            cost_estimate=cost,
        )(x2d, self.w_p, self.b_p)

        y = y_pad
        if n_pad != n or self.out_pad != self.out_dim:
            y = y_pad[:n, :self.out_dim]
        return y.reshape(orig_shape[:-1] + (self.out_dim,))


def init_linear_params(key, in_dim, out_dim, dtype=jnp.float32):
    """Deterministic synthetic init mimicking torch_geometric Linear:
    kaiming_uniform(a=sqrt(5)) for weight, uniform(+-1/sqrt(fan_in)) for bias."""
    kw, kb = jax.random.split(key)
    bound = 1.0 / math.sqrt(in_dim)
    weight = jax.random.uniform(kw, (out_dim, in_dim), dtype, -bound, bound)
    bias = jax.random.uniform(kb, (out_dim,), dtype, -bound, bound)
    return weight, bias


if __name__ == "__main__":
    key = jax.random.PRNGKey(0)
    k_x, k_p, k_x2, k_p2 = jax.random.split(key, 4)

    # Case 1: small GNN-style Linear -> weight-resident, scratch-free fast path
    # (bf16 compute, f32 MXU accumulation).
    N, in_dim, out_dim = 64, 32, 32
    x = jax.random.normal(k_x, (N, in_dim), jnp.float32)
    weight, bias = init_linear_params(k_p, in_dim, out_dim)
    lin = PallasLinear(weight, bias)
    y = jax.block_until_ready(lin(x))
    y_ref = (jnp.dot(x.astype(jnp.bfloat16), weight.T.astype(jnp.bfloat16),
                     preferred_element_type=jnp.float32)
             + bias[None, :]).astype(x.dtype)
    assert y.shape == (N, out_dim)
    assert jnp.allclose(y, y_ref, atol=5e-3, rtol=5e-3), "fast-path mismatch"

    # Case 2: force the tiled 3-D accumulator path (grid_k > 1, bias folded into
    # the accumulator init), f32 compute, ragged shapes exercising the padding.
    N2, in2, out2 = 72, 200, 136
    x2 = jax.random.normal(k_x2, (N2, in2), jnp.float32)
    w2, b2 = init_linear_params(k_p2, in2, out2)
    lin2 = PallasLinear(w2, b2, compute_dtype=jnp.float32,
                        force_tiled=True, tm=32, tn=128, tk=128)
    y2 = jax.block_until_ready(lin2(x2))
    y2_ref = x2 @ w2.T + b2[None, :]
    assert y2.shape == (N2, out2)
    assert jnp.allclose(y2, y2_ref, atol=1e-4, rtol=1e-4), "tiled-path mismatch"

    print("KERNEL_OK")
</pallas_src>

<mosaic_0001>
module attributes {stable_mosaic.version = 11 : i64} {
  func.func @_linear_bias_kernel(%arg0: i32, %arg1: i32, %arg2: memref<64x128xbf16, #tpu.memory_space<vmem>>, %arg3: memref<128x128xbf16, #tpu.memory_space<vmem>>, %arg4: memref<1x128xf32, #tpu.memory_space<vmem>>, %arg5: memref<64x128xf32, #tpu.memory_space<vmem>>) attributes {dimension_semantics = [#tpu.dimension_semantics<parallel>, #tpu.dimension_semantics<parallel>], iteration_bounds = array<i64: 1, 1>, scalar_prefetch = 0 : i64, scratch_operands = 0 : i64, tpu.core_type = #tpu.core_type<tc>, window_params = [{transform_indices = @transform_0, window_bounds = array<i64: 64, 128>}, {transform_indices = @transform_1, window_bounds = array<i64: 128, 128>}, {transform_indices = @transform_2, window_bounds = array<i64: 1, 128>}, {transform_indices = @transform_3, window_bounds = array<i64: 64, 128>}]} {
    %c0 = arith.constant 0 : index
    %c0_0 = arith.constant 0 : index
    %0 = vector.load %arg2[%c0, %c0_0] : memref<64x128xbf16, #tpu.memory_space<vmem>>, vector<64x128xbf16>
    %c0_1 = arith.constant 0 : index
    %c0_2 = arith.constant 0 : index
    %1 = vector.load %arg3[%c0_1, %c0_2] : memref<128x128xbf16, #tpu.memory_space<vmem>>, vector<128x128xbf16>
    %cst = arith.constant dense<0.000000e+00> : vector<64x128xf32>
    %2 = tpu.matmul %0, %1, %cst {dimension_numbers = #tpu.dot_dimension_numbers<[1], [0], [0], [1], [0, 0, 1, 1], [], []>} : vector<64x128xbf16>, vector<128x128xbf16>, vector<64x128xf32> -> vector<64x128xf32>
    %c0_3 = arith.constant 0 : index
    %c0_4 = arith.constant 0 : index
    %3 = vector.load %arg4[%c0_3, %c0_4] : memref<1x128xf32, #tpu.memory_space<vmem>>, vector<1x128xf32>
    %4 = vector.broadcast %3 : vector<1x128xf32> to vector<64x128xf32>
    %5 = arith.addf %2, %4 : vector<64x128xf32>
    %c0_5 = arith.constant 0 : index
    %c0_6 = arith.constant 0 : index
    %6 = vector.load %arg5[%c0_5, %c0_6] : memref<64x128xf32, #tpu.memory_space<vmem>>, vector<64x128xf32>
    tpu.vector_store %arg5[%c0_5, %c0_6], %5 {strides = array<i32>} : memref<64x128xf32, #tpu.memory_space<vmem>>, vector<64x128xf32>,
    return
  }
  func.func @transform_0(%arg0: i32, %arg1: i32) -> (i32, i32) {
    %c0_i32 = arith.constant 0 : i32
    %c0_i32_0 = arith.constant 0 : i32
    return %arg0, %c0_i32 : i32, i32
  }
  func.func @transform_1(%arg0: i32, %arg1: i32) -> (i32, i32) {
    %c0_i32 = arith.constant 0 : i32
    %c0_i32_0 = arith.constant 0 : i32
    return %c0_i32, %arg1 : i32, i32
  }
  func.func @transform_2(%arg0: i32, %arg1: i32) -> (i32, i32) {
    %c0_i32 = arith.constant 0 : i32
    %c0_i32_0 = arith.constant 0 : i32
    return %c0_i32, %arg1 : i32, i32
  }
  func.func @transform_3(%arg0: i32, %arg1: i32) -> (i32, i32) {
    %c0_i32 = arith.constant 0 : i32
    return %arg0, %arg1 : i32, i32
  }
}

</mosaic_0001>

<bundles_post_ra>
// kernel: tpu_custom_call.1
= control target key start
LH: loop header
LB: loop body
LE: loop exit
PB: predicated region body
PF: predicated region fallthrough
CT: control target
= control target key end

     0   :  { %8 = vsyncpa [#allocation3], 0  ;;  %s427_s0 = inlined_call_operand.hbm [shape: bf16[64,128], index: 0, kind: input, shape index: {}]   ;;  %s428_s1 = inlined_call_operand.hbm [shape: bf16[128,128], index: 1, kind: input, shape index: {}]   ;;  %s429_s2 = inlined_call_operand.vmem [shape: f32[1,128], index: 2, kind: input, shape index: {}]   ;;  %s430_s3 = inlined_call_operand.hbm [shape: f32[64,128], index: 3, kind: output, shape index: {}]  }
   0x1   :  { %9 = vsyncpa [#allocation6], 0 }
   0x2   :  { %10 = vsyncpa [#allocation4], 0  ;;  %s388_s12 = smov [#allocation2]  }
   0x3   :  { %s16_s13 = sshll.u32 %s388_s12, 4  ;;  %s17_s13 = int_to_ptr.vmem [resolvable:$true] %s16_s13 }
   0x4   :  { %s330_s14 = scalar_lea.vmem %s17_s13, 512  ;;  %p335_p1 = scmp.lt.s32.totalorder %s17_s13, %s17_s13 }
   0x5   :  { %p331_p0 = scmp.ne.s32.totalorder %s17_s13, %s330_s14  ;;  %p336_p2 = scmp.lt.s32.totalorder %s330_s14, %s330_s14 }
   0x7   :  { %p337_p3 = por %p336_p2, %p335_p1 }
   0x9   :  { %p338_p4 = pnand %p337_p3, %p331_p0 }
   0xb   :  { %341 = shalt.err (!%p338_p4)
}
   0xc   :  { %s389_s15 = smov 64   ;;  %s390_s16 = smov 4  }
   0xd   :  { %22 = dma.hbm_to_vmem [thread:$0]  %s427_s0, 512, %s17_s13, [#allocation3], %s389_s15, %s389_s15, %s390_s16  }
   0xe   :  { %s391_s19 = smov [#allocation5]  }
   0xf   :  { %s28_s20 = sshll.u32 %s391_s19, 4  ;;  %s29_s20 = int_to_ptr.vmem [resolvable:$true] %s28_s20 }
  0x10   :  { %s350_s21 = scalar_lea.vmem %s29_s20, 1024  ;;  %p355_p6 = scmp.lt.s32.totalorder %s29_s20, %s29_s20 }
  0x11   :  { %p351_p5 = scmp.ne.s32.totalorder %s29_s20, %s350_s21  ;;  %p356_p7 = scmp.lt.s32.totalorder %s350_s21, %s350_s21 }
  0x13   :  { %p357_p8 = por %p356_p7, %p355_p6 }
  0x15   :  { %p358_p9 = pnand %p357_p8, %p351_p5 }
  0x17   :  { %361 = shalt.err (!%p358_p9)
}
  0x18   :  { %34 = dma.hbm_to_vmem [thread:$0]  %s428_s1, 1024, %s29_s20, [#allocation6], %s389_s15, %s389_s15, %s390_s16  }
  0x19   :  { %382 = dma.done.wait [#allocation3], 512  }
  0x1a   :  { %383 = vsyncadd [#allocation3], 4294966784 }
  0x1b   :  { %384 = dma.done.wait [#allocation6], 1024  }
  0x1c   :  { %385 = vsyncadd [#allocation6], 4294966272  ;;  %v310_v0 = vld [vmem:[#allocation5 + $0x38] sm:$0xff]   ;;  %v311_v1 = vld [vmem:[#allocation5 + $0x30] sm:$0xff]   ;;  %s392_s24 = smov [#allocation7]  }
  0x1d   :  { %263 = vmatprep.subr.bf16.mxu0 %v310_v0  ;;  %287 = vmatprep.subr.bf16.mxu1 %v310_v0  ;;  %v312_v2 = vld [vmem:[#allocation5 + $0x28] sm:$0xff]   ;;  %v313_v3 = vld [vmem:[#allocation5 + $0x20] sm:$0xff]   ;;  %v319_v5 = vld [vmem:[#allocation2 + $0x10] sm:$0xff]   ;;  %s225_s25 = sshll.u32 %s392_s24, 4  ;;  %s226_s25 = int_to_ptr.vmem [resolvable:$true] %s225_s25 }
  0x1e   :  { %264 = vmatpush3.bf16.msra.mxu0 %v310_v0  ;;  %295 = vmatpush3.bf16.msra.mxu1 %v310_v0  ;;  %v318_v4 = vld [vmem:[#allocation2] sm:$0xff]   ;;  %v314_v6 = vld [vmem:[#allocation5 + $0x18] sm:$0xff]   ;;  %v315_v7 = vld [vmem:[#allocation5 + $0x10] sm:$0xff]   ;;  %p367_p11 = scmp.lt.s32.totalorder %s226_s25, %s226_s25 }
  0x1f   :  { %265 = vmatprep.subr.bf16.mxu0 %v311_v1  ;;  %288 = vmatprep.subr.bf16.mxu1 %v311_v1  ;;  %v316_v8 = vld [vmem:[#allocation5 + $0x8] sm:$0xff]   ;;  %v317_v9 = vld [vmem:[#allocation5] sm:$0xff]   ;;  %v321_v11 = vld [vmem:[#allocation2 + $0x18] sm:$0xff]  }
  0x20   :  { %279 = vmatprep.mubr.bf16.mxu0 %v318_v4  ;;  %283 = vmatprep.mubr.bf16.mxu1 %v319_v5  ;;  %v320_v10 = vld [vmem:[#allocation2 + $0x8] sm:$0xff]   ;;  %v238_v12 = vld [vmem:[%s429_s2] ss:$0 sm:$0xff]  ;;  %s362_s2 = scalar_lea.vmem %s226_s25, 1024 }
  0x21   :  { %p363_p10 = scmp.ne.s32.totalorder %s226_s25, %s362_s2  ;;  %p368_p12 = scmp.lt.s32.totalorder %s362_s2, %s362_s2 }
  0x22   :  { %266 = vmatpush3.bf16.msra.mxu0 %v311_v1  ;;  %296 = vmatpush3.bf16.msra.mxu1 %v311_v1 }
  0x23   :  { %267 = vmatprep.subr.bf16.mxu0 %v312_v2  ;;  %289 = vmatprep.subr.bf16.mxu1 %v312_v2  ;;  %p369_p13 = por %p368_p12, %p367_p11 }
  0x25   :  { %p370_p0 = pnand %p369_p13, %p363_p10 }
  0x26   :  { %268 = vmatpush3.bf16.msra.mxu0 %v312_v2  ;;  %297 = vmatpush3.bf16.msra.mxu1 %v312_v2 }
  0x27   :  { %269 = vmatprep.subr.bf16.mxu0 %v313_v3  ;;  %290 = vmatprep.subr.bf16.mxu1 %v313_v3 }
  0x2a   :  { %270 = vmatpush3.bf16.msra.mxu0 %v313_v3  ;;  %298 = vmatpush3.bf16.msra.mxu1 %v313_v3 }
  0x2b   :  { %271 = vmatprep.subr.bf16.mxu0 %v314_v6  ;;  %291 = vmatprep.subr.bf16.mxu1 %v314_v6 }
  0x2e   :  { %272 = vmatpush3.bf16.msra.mxu0 %v314_v6  ;;  %299 = vmatpush3.bf16.msra.mxu1 %v314_v6 }
  0x2f   :  { %273 = vmatprep.subr.bf16.mxu0 %v315_v7  ;;  %292 = vmatprep.subr.bf16.mxu1 %v315_v7 }
  0x32   :  { %274 = vmatpush3.bf16.msra.mxu0 %v315_v7  ;;  %300 = vmatpush3.bf16.msra.mxu1 %v315_v7 }
  0x33   :  { %275 = vmatprep.subr.bf16.mxu0 %v316_v8  ;;  %293 = vmatprep.subr.bf16.mxu1 %v316_v8 }
  0x36   :  { %276 = vmatpush3.bf16.msra.mxu0 %v316_v8  ;;  %301 = vmatpush3.bf16.msra.mxu1 %v316_v8 }
  0x37   :  { %277 = vmatprep.subr.bf16.mxu0 %v317_v9  ;;  %294 = vmatprep.subr.bf16.mxu1 %v317_v9 }
  0x3a   :  { %278 = vmatpush3.bf16.msra.mxu0 %v317_v9  ;;  %302 = vmatpush3.bf16.msra.mxu1 %v317_v9 }
  0x3d   :  { %280 = vmatmul.mubr.bf16.vlgmr.msra.gmra.mxu0 %v320_v10  ;;  %284 = vmatmul.mubr.bf16.vlgmr.msra.gmra.mxu1 %v321_v11 }
  0xfd   :  { %v281_v13 = vpop.f32.mrf.mxu0  ;;  %v285_v14 = vpop.f32.mrf.mxu1 }
  0xfe   :  { %v190_v15 = vadd.f32 %v281_v13, %v238_v12  ;;  %v206_v16 = vadd.f32 %v285_v14, %v238_v12 }
  0xff   :  { %v181_v17 = vpop.f32.mrf.mxu0  ;;  %v197_v18 = vpop.f32.mrf.mxu1 }
 0x100   :  { %214 = vst [vmem:[#allocation7 + $0x10] sm:$0xff] %v190_v15  ;;  %218 = vst [vmem:[#allocation7 + $0x30] sm:$0xff] %v206_v16  ;;  %v182_v19 = vadd.f32 %v238_v12, %v181_v17  ;;  %v198_v20 = vadd.f32 %v238_v12, %v197_v18 }
 0x101   :  { %v282_v21 = vpop.f32.mrf.mxu0  ;;  %v286_v22 = vpop.f32.mrf.mxu1 }
 0x102   :  { %212 = vst [vmem:[#allocation7] sm:$0xff] %v182_v19  ;;  %216 = vst [vmem:[#allocation7 + $0x20] sm:$0xff] %v198_v20  ;;  %v193_v23 = vadd.f32 %v282_v21, %v238_v12  ;;  %v209_v24 = vadd.f32 %v286_v22, %v238_v12 }
 0x103   :  { %v184_v25 = vpop.f32.mrf.mxu0  ;;  %v200_v26 = vpop.f32.mrf.mxu1 }
 0x104   :  { %215 = vst [vmem:[#allocation7 + $0x18] sm:$0xff] %v193_v23  ;;  %219 = vst [vmem:[#allocation7 + $0x38] sm:$0xff] %v209_v24  ;;  %v185_v27 = vadd.f32 %v238_v12, %v184_v25  ;;  %v201_v28 = vadd.f32 %v238_v12, %v200_v26 }
 0x106   :  { %213 = vst [vmem:[#allocation7 + $0x8] sm:$0xff] %v185_v27  ;;  %217 = vst [vmem:[#allocation7 + $0x28] sm:$0xff] %v201_v28 }
 0x107   :  { %373 = shalt.err (!%p370_p0)
}
 0x108   :  { %s393_s26 = smov 128   ;;  %s394_s27 = smov 8  }
 0x109   :  { %231 = dma.vmem_to_hbm [thread:$0]  %s226_s25, 1024, %s430_s3, [#allocation4], %s393_s26, %s393_s26, %s394_s27  }
 0x10a   :  { %386 = dma.done.wait [#allocation4], 1024  }
 0x10b   :  { %387 = vsyncadd [#allocation4], 4294966272 }
 0x10c   :  { %235 = vsyncpa [#allocation3], 1 }
 0x10d   :  { %236 = vsyncpa [#allocation6], 1 }
 0x10e   :  { %237 = vsyncpa [#allocation4], 1 }

</bundles_post_ra>
